<compile_context>
chip_gen: v5e
topology: v5e:2x2
jax: 0.10.0
libtpu: 0.0.40
codegen_flags: <defaults>
</compile_context>

<pallas_src>
import jax
import jax.numpy as jnp
from jax.experimental import pallas as pl
from jax.experimental.pallas import tpu as pltpu


def _vmem_budget():
    """Generation-aware VMEM budget (v5e/v6e: 128 MiB physical, v7x: 64 MiB)."""
    try:
        vmem = int(pltpu.get_tpu_info().vmem_capacity_bytes)
    except Exception:
        vmem = 64 << 20                        # conservative fallback (v7x-sized)
    limit = min((vmem * 3) // 4, 96 << 20)     # 48 MiB on v7x, 96 MiB on v5e/v6e
    block_target = limit // 8                  # 2x in + 2x out double-buffered blocks + headroom
    return limit, block_target


_VMEM_LIMIT_BYTES, _BLOCK_TARGET_BYTES = _vmem_budget()


def _pick_batch_pack(n, c):
    """Largest G dividing N with G*C <= 256 (fills the MXU contraction/M dims)."""
    max_g = max(1, 256 // c)
    for g in range(min(n, max_g), 0, -1):
        if n % g == 0:
            return g
    return 1


def _pick_spatial_tile(hw, rows, itemsize, batch_steps):
    """Lane-dim tile: multiple of 128 (or full extent), sized near the per-block
    VMEM target while keeping >= ~4 total grid steps for megacore pipelining."""
    if hw <= 128:
        return hw                               # full-extent block (always legal)
    t = max(128, min(hw, (_BLOCK_TARGET_BYTES // (rows * itemsize)) // 128 * 128))
    while batch_steps * pl.cdiv(hw, t) < 4 and t > 128:
        t = max(128, (t // 2) // 128 * 128)
    return int(t)


def _ssaamm_kernel(x_ref, w_ref, b_ref, out_ref):
    # x_ref / out_ref : (G*C, T_HW) tile — G packed batch elements, spatial on lanes.
    # w_ref           : (G*C, G*C) block-diagonal 1x1-conv weight (resident across grid).
    # b_ref           : (G*C, 1)   tiled 1x1-conv bias            (resident across grid).
    x = x_ref[...]
    residual = jnp.dot(w_ref[...], x.astype(w_ref.dtype),
                       preferred_element_type=jnp.float32)
    out_ref[...] = (x.astype(jnp.float32) + residual + b_ref[...]).astype(out_ref.dtype)


@jax.jit
def ssaamm_forward(x_nchw, w_res, b_res):
    """SSAAMM forward: exactly  x + Conv2d(C, C, kernel_size=1)(x)."""
    N, C, H, W = x_nchw.shape
    HW = H * W
    itemsize = jnp.dtype(x_nchw.dtype).itemsize

    # Pack G batch elements per grid step (free contiguous reshape) so the MXU
    # contraction / output-row dims approach the 128/256-wide systolic tile.
    G = _pick_batch_pack(N, C)
    GC = G * C
    NB = N // G
    x = x_nchw.reshape(NB, GC, HW)                                   # caller dtype, no copy

    w_blk = jnp.kron(jnp.eye(G, dtype=jnp.float32),                  # block-diagonal (GC, GC)
                     w_res.astype(jnp.float32))
    b_blk = jnp.tile(b_res.astype(jnp.float32).reshape(C, 1), (G, 1))  # (GC, 1)

    t_hw = _pick_spatial_tile(HW, GC, itemsize, NB)
    grid = (NB, pl.cdiv(HW, t_hw))

    cost = pl.CostEstimate(
        flops=2 * N * C * C * HW,
        transcendentals=0,
        bytes_accessed=2 * N * C * HW * itemsize + GC * GC * 4 + GC * 4,
    )

    out = pl.pallas_call(
        _ssaamm_kernel,
        out_shape=jax.ShapeDtypeStruct((NB, GC, HW), x_nchw.dtype),
        grid_spec=pltpu.PrefetchScalarGridSpec(
            num_scalar_prefetch=0,
            grid=grid,
            in_specs=[
                pl.BlockSpec((None, GC, t_hw), lambda n, j: (n, 0, j)),  # x tile
                pl.BlockSpec((GC, GC), lambda n, j: (0, 0)),             # block-diag weight (resident)
                pl.BlockSpec((GC, 1), lambda n, j: (0, 0)),              # tiled bias (resident)
            ],
            out_specs=pl.BlockSpec((None, GC, t_hw), lambda n, j: (n, 0, j)),
        ),
        compiler_params=pltpu.CompilerParams(
            dimension_semantics=("parallel", "parallel"),
            vmem_limit_bytes=_VMEM_LIMIT_BYTES,
        ),
        cost_estimate=cost,
    )(x, w_blk, b_blk)

    return out.reshape(N, C, H, W)


if __name__ == "__main__":
    channels, factor = 32, 16          # channels must be divisible by factor
    N, H, W = 2, 16, 16

    key = jax.random.PRNGKey(0)
    k_x, k_w, k_b = jax.random.split(key, 3)
    x = jax.random.normal(k_x, (N, channels, H, W), jnp.float32)   # NCHW like PyTorch

    # Conv2d(C, C, 1) parameters (PyTorch weight (C_out, C_in, 1, 1) -> (C_out, C_in)).
    w_res = 0.05 * jax.random.normal(k_w, (channels, channels), jnp.float32)
    b_res = 0.05 * jax.random.normal(k_b, (channels,), jnp.float32)
    # NOTE: the module's conv1x1 / GroupNorm / conv3x3 / BatchNorm parameters are
    # not materialized: softmax over the singleton pooled axis ≡ 1, so they have
    # no effect on the forward output.

    out = jax.block_until_ready(ssaamm_forward(x, w_res, b_res))

    # Reference check against the mathematically identical dense formula.
    ref = x + jnp.einsum("oc,nchw->nohw", w_res, x) + b_res.reshape(1, channels, 1, 1)
    assert out.shape == (N, channels, H, W)
    assert out.dtype == x.dtype
    assert bool(jnp.all(jnp.isfinite(out)))
    assert bool(jnp.allclose(out, ref, rtol=1e-4, atol=1e-4))
    print("KERNEL_OK")
</pallas_src>

<mosaic_0001>
module attributes {stable_mosaic.version = 11 : i64} {
  func.func @_ssaamm_kernel(%arg0: i32, %arg1: i32, %arg2: memref<1x64x128xf32, #tpu.memory_space<vmem>>, %arg3: memref<64x64xf32, #tpu.memory_space<vmem>>, %arg4: memref<64x1xf32, #tpu.memory_space<vmem>>, %arg5: memref<1x64x128xf32, #tpu.memory_space<vmem>>) attributes {dimension_semantics = [#tpu.dimension_semantics<parallel>, #tpu.dimension_semantics<parallel>], iteration_bounds = array<i64: 1, 2>, scalar_prefetch = 0 : i64, scratch_operands = 0 : i64, tpu.core_type = #tpu.core_type<tc>, window_params = [{transform_indices = @transform_0, window_bounds = array<i64: 1, 64, 128>}, {pipeline_mode = #tpu.pipeline_mode<synchronous>, transform_indices = @transform_1, window_bounds = array<i64: 64, 64>}, {pipeline_mode = #tpu.pipeline_mode<synchronous>, transform_indices = @transform_2, window_bounds = array<i64: 64, 1>}, {transform_indices = @transform_3, window_bounds = array<i64: 1, 64, 128>}]} {
    %c0 = arith.constant 0 : index
    %c0_0 = arith.constant 0 : index
    %c0_1 = arith.constant 0 : index
    %0 = vector.load %arg2[%c0, %c0_0, %c0_1] : memref<1x64x128xf32, #tpu.memory_space<vmem>>, vector<1x64x128xf32>
    %1 = vector.shape_cast %0 : vector<1x64x128xf32> to vector<64x128xf32>
    %c0_2 = arith.constant 0 : index
    %c0_3 = arith.constant 0 : index
    %2 = vector.load %arg3[%c0_2, %c0_3] : memref<64x64xf32, #tpu.memory_space<vmem>>, vector<64x64xf32>
    %cst = arith.constant dense<0.000000e+00> : vector<64x128xf32>
    %3 = tpu.matmul %2, %1, %cst {dimension_numbers = #tpu.dot_dimension_numbers<[1], [0], [0], [1], [0, 0, 1, 1], [], []>} : vector<64x64xf32>, vector<64x128xf32>, vector<64x128xf32> -> vector<64x128xf32>
    %4 = arith.addf %1, %3 : vector<64x128xf32>
    %c0_4 = arith.constant 0 : index
    %c0_5 = arith.constant 0 : index
    %5 = vector.load %arg4[%c0_4, %c0_5] : memref<64x1xf32, #tpu.memory_space<vmem>>, vector<64x1xf32>
    %6 = vector.broadcast %5 : vector<64x1xf32> to vector<64x128xf32>
    %7 = arith.addf %4, %6 : vector<64x128xf32>
    %c0_6 = arith.constant 0 : index
    %c0_7 = arith.constant 0 : index
    %c0_8 = arith.constant 0 : index
    %8 = vector.load %arg5[%c0_6, %c0_7, %c0_8] : memref<1x64x128xf32, #tpu.memory_space<vmem>>, vector<1x64x128xf32>
    %9 = vector.shape_cast %8 : vector<1x64x128xf32> to vector<64x128xf32>
    %10 = vector.shape_cast %7 : vector<64x128xf32> to vector<1x64x128xf32>
    tpu.vector_store %arg5[%c0_6, %c0_7, %c0_8], %10 {strides = array<i32>} : memref<1x64x128xf32, #tpu.memory_space<vmem>>, vector<1x64x128xf32>,
    return
  }
  func.func @transform_0(%arg0: i32, %arg1: i32) -> (i32, i32, i32) {
    %c0_i32 = arith.constant 0 : i32
    %c0_i32_0 = arith.constant 0 : i32
    return %arg0, %c0_i32, %arg1 : i32, i32, i32
  }
  func.func @transform_1(%arg0: i32, %arg1: i32) -> (i32, i32) {
    %c0_i32 = arith.constant 0 : i32
    %c0_i32_0 = arith.constant 0 : i32
    %c0_i32_1 = arith.constant 0 : i32
    return %c0_i32, %c0_i32_0 : i32, i32
  }
  func.func @transform_2(%arg0: i32, %arg1: i32) -> (i32, i32) {
    %c0_i32 = arith.constant 0 : i32
    %c0_i32_0 = arith.constant 0 : i32
    %c0_i32_1 = arith.constant 0 : i32
    return %c0_i32, %c0_i32_0 : i32, i32
  }
  func.func @transform_3(%arg0: i32, %arg1: i32) -> (i32, i32, i32) {
    %c0_i32 = arith.constant 0 : i32
    %c0_i32_0 = arith.constant 0 : i32
    return %arg0, %c0_i32, %arg1 : i32, i32, i32
  }
}

</mosaic_0001>

<bundles_post_ra>
// kernel: ssaamm_forward.1
= control target key start
LH: loop header
LB: loop body
LE: loop exit
PB: predicated region body
PF: predicated region fallthrough
CT: control target
= control target key end

     0   :  { %s691_s12 = smov 0   ;;  %s693_s13 = smov 0   ;;  %s893_s0 = inlined_call_operand.vmem [shape: f32[1,64,256], index: 0, kind: input, shape index: {}]   ;;  %s894_s1 = inlined_call_operand.vmem [shape: f32[64,64], index: 1, kind: input, shape index: {}]   ;;  %s895_s2 = inlined_call_operand.vmem [shape: f32[64,1], index: 2, kind: input, shape index: {}]   ;;  %s896_s3 = inlined_call_operand.vmem [shape: f32[1,64,256], index: 3, kind: output, shape index: {}]  }
   0x1   :  { %s695_s14 = smov 0   ;;  %s697_s15 = smov 0  }
   0x2   :  { %s699_s16 = smov 0  }
   0x3 LB: > { %s22_s17 = sadd.s32 1, %s664_s15  ;;  %s541_s18 = sadd.s32 4294967295, %s668_s16   ;;  %s668_s16 = sphi %s699_s16, %s13_s16   ;;  %s664_s15 = sphi %s697_s15, %s901_s15   ;;  %s660_s14 = sphi %s695_s14, %s900_s14   ;;  %s656_s13 = sphi %s693_s13, %s899_s13   ;;  %s652_s12 = sphi %s691_s12, %s898_s12  }
   0x4   : > { %p23_p0 = scmp.ge.s32.totalorder %s22_s17, 2  ;;  %p41_p1 = scmp.ne.s32.totalorder %s656_s13, %s652_s12 }
   0x5   : > { %p42_p2 = scmp.eq.s32.totalorder %s668_s16, 0  ;;  %p115_p4 = scmp.eq.s32.totalorder %s541_s18, 1 }
   0x6   : > { %s903_s17 = smov (%p23_p0, %s22_s17), 0  ;;  %s34_s20 = sadd.s32 1, %s656_s13 }
   0x7   : > { %p43_p3 = por %p42_p2, %p41_p1  ;;  %s30_s19 = ssub.s32 %s664_s15, %s903_s17 }
   0x8   : > { %p32_p5 = scmp.eq.s32.totalorder %s30_s19, 0  ;;  %p726_p6 = por %p115_p4, %p41_p1 }
   0x9   : > { %p544_p7 = scmp.ge.s32.totalorder %s668_s16, 2 }
   0xa   : > { %s731_s22 = scalar_select %p32_p5, %s656_s13, %s34_s20  }
   0xb   : > { %143 = sbr.rel (%p544_p7) target bundleno = 28 (0x1c), region = 24 }
  0x10   : > { %146 = sbr.rel (!%p43_p3) target bundleno = 28 (0x1c), region = 28  ;;  %s148_s23 = sand.u32 (%p43_p3), 1, %s656_s13  }
  0x11   : > { %s546_s24 = sshll.u32 (%p43_p3), %s664_s15, 3  ;;  %s545_s25 = sshll.u32 (%p43_p3), %s148_s23, 6 }
  0x12   : > { %s154_s28 = scalar_lea.vmem (%p43_p3), %s893_s0, %s546_s24  ;;  %s150_s29 = scalar_lea.vmem (%p43_p3), [#allocation2], %s545_s25 }
  0x13   : > { %v197_v0 = vld [vmem:[%s154_s28] sm:$0xff] (%p43_p3)  ;;  %v199_v1 = vld [vmem:[%s154_s28 + $0x10] sm:$0xff] (%p43_p3) }
  0x14   : > { %v201_v2 = vld [vmem:[%s154_s28 + $0x20] sm:$0xff] (%p43_p3)  ;;  %198 = vst [vmem:[%s150_s29] sm:$0xff] (%p43_p3), %v197_v0  ;;  %v203_v3 = vld [vmem:[%s154_s28 + $0x30] sm:$0xff] (%p43_p3) }
  0x15   : > { %200 = vst [vmem:[%s150_s29 + $0x8] sm:$0xff] %v199_v1  ;;  %v205_v4 = vld [vmem:[%s154_s28 + $0x40] sm:$0xff]  ;;  %v207_v5 = vld [vmem:[%s154_s28 + $0x50] sm:$0xff] }
  0x16   : > { %202 = vst [vmem:[%s150_s29 + $0x10] sm:$0xff] %v201_v2  ;;  %v209_v6 = vld [vmem:[%s154_s28 + $0x60] sm:$0xff]  ;;  %v211_v7 = vld [vmem:[%s154_s28 + $0x70] sm:$0xff] }
  0x17   : > { %204 = vst [vmem:[%s150_s29 + $0x18] sm:$0xff] %v203_v3 }
  0x18   : > { %206 = vst [vmem:[%s150_s29 + $0x20] sm:$0xff] %v205_v4 }
  0x19   : > { %208 = vst [vmem:[%s150_s29 + $0x28] sm:$0xff] %v207_v5 }
  0x1a   : > { %210 = vst [vmem:[%s150_s29 + $0x30] sm:$0xff] %v209_v6 }
  0x1b   : > { %212 = vst [vmem:[%s150_s29 + $0x38] sm:$0xff] %v211_v7 }
  0x1c PF: > { %p547_p8 = scmp.ge.s32.totalorder %s668_s16, 1  ;;  %p217_p9 = scmp.lt.s32.totalorder %s668_s16, 3 }
  0x1e   : > { %p218_p10 = pnand %p547_p8, %p217_p9 }
  0x1f   : > { %s224_s30 = sand.u32 (!%p218_p10), 1, %s652_s12  }
  0x20   : > { %221 = sbr.rel (%p218_p10) target bundleno = 211 (0xd3), region = 66  ;;  %s748_s8 = sshll.u32 (!%p218_p10), %s224_s30, 6 }
  0x21   : > { %s751_s9 = scalar_lea.vmem (!%p218_p10), [#allocation2], %s748_s8  ;;  %s848_s26 = scalar_lea.vmem (!%p218_p10), [#allocation3], %s748_s8 }
  0x25   : > { %v338_v8 = vld [vmem:[%s895_s2 + $0x10] sm:$0xff]  ;;  %v336_v9 = vld [vmem:[%s895_s2] sm:$0xff]  ;;  %v670_v10 = vmov 0   ;;  %v754_v11 = vld [vmem:[%s751_s9 + $0x38] sm:$0xff]  ;;  %vm262_vm0 = vcmask 523264   ;;  %s559_s8 = sshll.u32 (%p726_p6), %s660_s14, 3 }
  0x26   : > { %628 = vset.pattern.permute.xlu1 %v670_v10  ;;  %627 = vset.pattern.permute.xlu0 %v670_v10  ;;  %v757_v12 = vld [vmem:[%s751_s9 + $0x30] sm:$0xff]  ;;  %v764_v13 = vld [vmem:[%s751_s9 + $0x28] sm:$0xff]  ;;  %v771_v14 = vld [vmem:[%s751_s9 + $0x20] sm:$0xff]  ;;  %s410_s29 = scalar_lea.vmem (%p726_p6), %s896_s3, %s559_s8 }
  0x27   : > { %356 = vperm.xlu1 %628, %v338_v8   ;;  %346 = vperm.xlu0 %627, %v336_v9   ;;  %v778_v15 = vld [vmem:[%s751_s9 + $0x18] sm:$0xff]  ;;  %v248_v16 = vld [vmem:[%s751_s9 + $0x10] sm:$0xff]  ;;  %v790_v17 = vld [vmem:[%s751_s9 + $0x8] sm:$0xff] }
  0x28   : > { %629 = vset.pattern.permute.xlu2 %v670_v10  ;;  %295 = vmatpush.msra.mxu0 %v754_v11  ;;  %v246_v18 = vld [vmem:[%s751_s9] sm:$0xff]  ;;  %v256_v20 = vld [vmem:[%s894_s1 + $0x10] sm:$0xff]  ;;  %v339_v23 = vld [vmem:[%s895_s2 + $0x18] sm:$0xff] }
  0x29   : > { %562 = vmatpush.msra.mxu1 %v754_v11  ;;  %563 = vmatpush.msra.mxu2 %v754_v11  ;;  %v254_v19 = vld [vmem:[%s894_s1] sm:$0xff]  ;;  %v260_v22 = vld [vmem:[%s894_s1 + $0x30] sm:$0xff]  ;;  %v337_v24 = vld [vmem:[%s895_s2 + $0x8] sm:$0xff] }
  0x2a   : > { %564 = vmatpush.msra.mxu3 %v754_v11  ;;  %296 = vmatpush.msra.mxu0 %v757_v12  ;;  %v258_v21 = vld [vmem:[%s894_s1 + $0x20] sm:$0xff]  ;;  %v255_v26 = vld [vmem:[%s894_s1 + $0x8] sm:$0xff]  ;;  %v257_v27 = vld [vmem:[%s894_s1 + $0x18] sm:$0xff] }
  0x2b   : > { %565 = vmatpush.msra.mxu1 %v757_v12  ;;  %566 = vmatpush.msra.mxu2 %v757_v12  ;;  %v340_v25 = vld [vmem:[%s895_s2 + $0x20] sm:$0xff]  ;;  %v259_v28 = vld [vmem:[%s894_s1 + $0x28] sm:$0xff]  ;;  %v261_v29 = vld [vmem:[%s894_s1 + $0x38] sm:$0xff] }
  0x2c   : > { %567 = vmatpush.msra.mxu3 %v757_v12  ;;  %297 = vmatpush.msra.mxu0 %v764_v13  ;;  %v343_v30 = vld [vmem:[%s895_s2 + $0x38] sm:$0xff]  ;;  %v342_v31 = vld [vmem:[%s895_s2 + $0x30] sm:$0xff]  ;;  %v341_v32 = vld [vmem:[%s895_s2 + $0x28] sm:$0xff] }
  0x2d   : > { %568 = vmatpush.msra.mxu1 %v764_v13  ;;  %569 = vmatpush.msra.mxu2 %v764_v13 }
  0x2e   : > { %570 = vmatpush.msra.mxu3 %v764_v13  ;;  %298 = vmatpush.msra.mxu0 %v771_v14 }
  0x2f   : > { %571 = vmatpush.msra.mxu1 %v771_v14  ;;  %572 = vmatpush.msra.mxu2 %v771_v14 }
  0x30   : > { %573 = vmatpush.msra.mxu3 %v771_v14  ;;  %299 = vmatpush.msra.mxu0 %v778_v15 }
  0x31   : > { %574 = vmatpush.msra.mxu1 %v778_v15  ;;  %575 = vmatpush.msra.mxu2 %v778_v15 }
  0x32   : > { %576 = vmatpush.msra.mxu3 %v778_v15  ;;  %300 = vmatpush.msra.mxu0 %v248_v16 }
  0x33   : > { %577 = vmatpush.msra.mxu1 %v248_v16  ;;  %578 = vmatpush.msra.mxu2 %v248_v16 }
  0x34   : > { %579 = vmatpush.msra.mxu3 %v248_v16  ;;  %301 = vmatpush.msra.mxu0 %v790_v17 }
  0x35   : > { %580 = vmatpush.msra.mxu1 %v790_v17  ;;  %581 = vmatpush.msra.mxu2 %v790_v17 }
  0x36   : > { %582 = vmatpush.msra.mxu3 %v790_v17  ;;  %302 = vmatpush.msra.mxu0 %v246_v18 }
  0x37   : > { %583 = vmatpush.msra.mxu1 %v246_v18  ;;  %584 = vmatpush.msra.mxu2 %v246_v18 }
  0x38   : > { %585 = vmatpush.msra.mxu3 %v246_v18  ;;  %550 = vmatmul.msk.f32.vlgmr.msra.gmra.mxu0 %vm262_vm0, %v254_v19 }
  0x39   : > { %552 = vmatmul.msk.f32.vlgmr.msra.gmra.mxu1 %vm262_vm0, %v256_v20  ;;  %554 = vmatmul.msk.f32.vlgmr.msra.gmra.mxu2 %vm262_vm0, %v258_v21 }
  0x3a   : > { %556 = vmatmul.msk.f32.vlgmr.msra.gmra.mxu3 %vm262_vm0, %v260_v22  ;;  %361 = vperm.xlu1 %628, %v339_v23  }
  0x3b   : > { %351 = vperm.xlu0 %627, %v337_v24   ;;  %366 = vperm.xlu2 %629, %v340_v25  }
  0x40   : > { %551 = vmatmul.msk.f32.gmra.mxu0 %vm262_vm0, %v255_v26 }
  0x41   : > { %553 = vmatmul.msk.f32.gmra.mxu1 %vm262_vm0, %v257_v27  ;;  %555 = vmatmul.msk.f32.gmra.mxu2 %vm262_vm0, %v259_v28 }
  0x42   : > { %557 = vmatmul.msk.f32.gmra.mxu3 %vm262_vm0, %v261_v29  ;;  %381 = vperm.xlu1 %628, %v343_v30  }
  0x43   : > { %376 = vperm.xlu0 %627, %v342_v31   ;;  %371 = vperm.xlu2 %629, %v341_v32  }
  0x95   : > { %v367_v43 = vpop.permute.xlu2 %366 }
  0x99   : > { %v347_v33 = vpop.permute.xlu0 %346  ;;  %v357_v34 = vpop.permute.xlu1 %356 }
  0x9d   : > { %v372_v62 = vpop.permute.xlu2 %371 }
  0xac   : > { %v362_v42 = vpop.permute.xlu1 %361 }
  0xad   : > { %v352_v35 = vpop.permute.xlu0 %351 }
  0xb4   : > { %v382_v61 = vpop.permute.xlu1 %381 }
  0xb5   : > { %v304_v36 = vpop.f32.mrf.mxu0  ;;  %v377_v50 = vpop.permute.xlu0 %376 }
  0xb6   : > { %v310_v37 = vpop.f32.mrf.mxu1  ;;  %v328_v38 = vadd.f32 %v304_v36, %v246_v18 }
  0xb7   : > { %v330_v39 = vadd.f32 %v310_v37, %v248_v16 }
  0xb8   : > { %v384_v40 = vadd.f32 %v347_v33, %v328_v38 }
  0xb9   : > { %v386_v41 = vadd.f32 %v357_v34, %v330_v39 }
  0xba   : > { %392 = vst [vmem:[%s848_s26] sm:$0xff] %v384_v40 }
  0xbb   : > { %394 = vst [vmem:[%s848_s26 + $0x10] sm:$0xff] %v386_v41 }
  0xbc   : > { %v316_v44 = vpop.f32.mrf.mxu2 }
  0xbd   : > { %v322_v45 = vpop.f32.mrf.mxu3  ;;  %v332_v46 = vadd.f32 %v316_v44, %v771_v14  ;;  %v307_v48 = vpop.f32.mrf.mxu0 }
  0xbe   : > { %v334_v47 = vadd.f32 %v322_v45, %v757_v12  ;;  %v313_v49 = vpop.f32.mrf.mxu1  ;;  %v329_v51 = vadd.f32 %v307_v48, %v790_v17 }
  0xbf   : > { %v331_v52 = vadd.f32 %v313_v49, %v778_v15  ;;  %v388_v53 = vadd.f32 %v367_v43, %v332_v46 }
  0xc0   : > { %v390_v54 = vadd.f32 %v377_v50, %v334_v47  ;;  %v385_v55 = vadd.f32 %v352_v35, %v329_v51 }
  0xc1   : > { %v387_v56 = vadd.f32 %v362_v42, %v331_v52  ;;  %396 = vst [vmem:[%s848_s26 + $0x20] sm:$0xff] %v388_v53  ;;  %v453_v1 = vld [vmem:[%s848_s26] sm:$0xff] (%p726_p6) }
  0xc2   : > { %398 = vst [vmem:[%s848_s26 + $0x30] sm:$0xff] %v390_v54  ;;  %v457_v3 = vld [vmem:[%s848_s26 + $0x10] sm:$0xff] (%p726_p6) }
  0xc3   : > { %393 = vst [vmem:[%s848_s26 + $0x8] sm:$0xff] %v385_v55 }
  0xc4   : > { %395 = vst [vmem:[%s848_s26 + $0x18] sm:$0xff] %v387_v56  ;;  %v319_v57 = vpop.f32.mrf.mxu2 }
  0xc5   : > { %v325_v58 = vpop.f32.mrf.mxu3  ;;  %v333_v59 = vadd.f32 %v319_v57, %v764_v13  ;;  %454 = vst [vmem:[%s410_s29] sm:$0xff] (%p726_p6), %v453_v1 }
  0xc6   : > { %v335_v60 = vadd.f32 %v325_v58, %v754_v11  ;;  %406 = sbr.rel (!%p726_p6) target bundleno = 211 (0xd3), region = 74  ;;  %458 = vst [vmem:[%s410_s29 + $0x20] sm:$0xff] (%p726_p6), %v457_v3 }
  0xc7   : > { %v389_v63 = vadd.f32 %v372_v62, %v333_v59 }
  0xc8   : > { %v391_v0 = vadd.f32 %v382_v61, %v335_v60  ;;  %v461_v5 = vld [vmem:[%s848_s26 + $0x20] sm:$0xff] (%p726_p6) }
  0xc9   : > { %397 = vst [vmem:[%s848_s26 + $0x28] sm:$0xff] %v389_v63  ;;  %v465_v7 = vld [vmem:[%s848_s26 + $0x30] sm:$0xff] (%p726_p6) }
  0xca   : > { %399 = vst [vmem:[%s848_s26 + $0x38] sm:$0xff] %v391_v0  ;;  %v455_v2 = vld [vmem:[%s848_s26 + $0x8] sm:$0xff] (%p726_p6) }
  0xcb   : > { %v459_v4 = vld [vmem:[%s848_s26 + $0x18] sm:$0xff]  ;;  %456 = vst [vmem:[%s410_s29 + $0x10] sm:$0xff] %v455_v2 }
  0xcc   : > { %460 = vst [vmem:[%s410_s29 + $0x30] sm:$0xff] %v459_v4 }
  0xcd   : > { %462 = vst [vmem:[%s410_s29 + $0x40] sm:$0xff] %v461_v5 }
  0xce   : > { %466 = vst [vmem:[%s410_s29 + $0x60] sm:$0xff] %v465_v7 }
  0xd0   : > { %v463_v6 = vld [vmem:[%s848_s26 + $0x28] sm:$0xff] }
  0xd1   : > { %v467_v8 = vld [vmem:[%s848_s26 + $0x38] sm:$0xff]  ;;  %464 = vst [vmem:[%s410_s29 + $0x50] sm:$0xff] %v463_v6 }
  0xd2   : > { %468 = vst [vmem:[%s410_s29 + $0x70] sm:$0xff] %v467_v8 }
  0xd3 PF: > { %s13_s16 = sadd.s32 1, %s668_s16   ;;  %s898_s12 = smov %s656_s13 }
  0xd4   : > { %p10_p11 = scmp.ge.s32.totalorder %s13_s16, 4   ;;  %s899_s13 = smov %s731_s22 }
  0xd5   : > { %s900_s14 = smov %s664_s15  ;;  %s901_s15 = smov %s903_s17 }
  0xd6   :  { %12 = sbr.rel (!%p10_p11) target bundleno = 3 (0x3), region = 143 }

</bundles_post_ra>
